<compile_context>
chip_gen: v7x
topology: tpu7x:2x2x1
jax: 0.10.0
libtpu: 0.0.40
codegen_flags: <defaults>
</compile_context>

<pallas_src>
import math
import jax
import jax.numpy as jnp
from jax.experimental import pallas as pl
from jax.experimental.pallas import tpu as pltpu

_MIB = 1024 * 1024


def _pe_add_kernel(x_ref, pe_ref, o_ref):
    # One lane-dense VPU add per vreg; the cast is a no-op when dtypes match.
    o_ref[...] = x_ref[...] + pe_ref[...].astype(o_ref.dtype)


def make_positional_encoding(d_model: int, max_len: int = 5000, dtype=jnp.float32):
    """Deterministically build the pe buffer, exactly like the PyTorch __init__.

    Built once at init in the model dtype (review: hoist the per-call cast)."""
    assert d_model % 2 == 0, "d_model must be even (matches the PyTorch sin/cos interleave)"
    position = jnp.arange(max_len, dtype=jnp.float32)[:, None]                 # (max_len, 1)
    div_term = jnp.exp(jnp.arange(0, d_model, 2, dtype=jnp.float32)
                       * (-math.log(10000.0) / d_model))                       # (d_model//2,)
    pe = jnp.zeros((max_len, d_model), dtype=jnp.float32)
    pe = pe.at[:, 0::2].set(jnp.sin(position * div_term))
    pe = pe.at[:, 1::2].set(jnp.cos(position * div_term))
    return pe.astype(dtype)                                                    # (max_len, d_model)


def _vmem_capacity_bytes():
    """Generation-aware VMEM capacity; conservative fallback = v7x (64 MiB)."""
    try:
        cap = getattr(pltpu.get_tpu_info(), "vmem_capacity_bytes", None)
        if cap:
            return int(cap)
    except Exception:
        pass
    return 64 * _MIB


def _round_down(x, m):
    return (x // m) * m


def _choose_tiles(S, D, itemsize, sub, target_bytes):
    """Pick (tm, td). tm is a multiple of the dtype sublane multiple `sub`
    (or the full S when S < sub); td is the full D unless D alone exceeds the
    per-block budget, in which case td is a multiple of 128 lanes."""
    row_bytes = max(D * itemsize, 1)
    if row_bytes * sub <= target_bytes:
        td = D                                                  # full feature dim per block
        tm = _round_down(min(target_bytes // row_bytes, S), sub)
        if tm < sub:
            tm = S if S < sub else sub                          # S < sub -> full-extent rows
        return tm, td
    # Very large D: minimum rows, tile the lane dim in multiples of 128 (D >= 128 here).
    tm = S if S < sub else sub
    td = _round_down(target_bytes // (tm * itemsize), 128)
    td = max(128, min(td, _round_down(D, 128)))
    return tm, td


def positional_encoding_forward(x, pe):
    """x: [B, S, D], pe: [max_len, D] (full buffer) -> [B, S, D].  Dropout = identity."""
    B, S, D = x.shape
    max_len, d_model = pe.shape
    assert S <= max_len, f"sequence length {S} exceeds pe buffer max_len {max_len}"
    assert d_model == D, f"pe d_model {d_model} != input d_model {D}"

    itemsize = jnp.dtype(x.dtype).itemsize
    sub = max(8, 32 // itemsize)                   # 8 f32 / 16 bf16 / 32 int8-fp8 sublane multiple

    vmem_cap = _vmem_capacity_bytes()
    target_block_bytes = min(4 * _MIB, max(1 * _MIB, vmem_cap // 16))
    vmem_limit = int(min(vmem_cap * 3 // 4, max(32 * _MIB, 8 * target_block_bytes)))

    tm, td = _choose_tiles(S, D, itemsize, sub, target_block_bytes)
    n_s = pl.cdiv(S, tm)                           # ragged last block handled by Pallas masking
    n_d = pl.cdiv(D, td)

    return pl.pallas_call(
        _pe_add_kernel,
        out_shape=jax.ShapeDtypeStruct((B, S, D), x.dtype),
        grid_spec=pl.GridSpec(
            # Batch innermost: the pe block index (s, d) is unchanged across
            # consecutive steps, so pe is not re-DMA'd for every batch element.
            grid=(n_s, n_d, B),
            in_specs=[
                pl.BlockSpec((None, tm, td), lambda s, d, b: (b, s, d)),   # x
                pl.BlockSpec((tm, td), lambda s, d, b: (s, d)),            # pe (un-sliced buffer)
            ],
            out_specs=pl.BlockSpec((None, tm, td), lambda s, d, b: (b, s, d)),
        ),
        compiler_params=pltpu.CompilerParams(
            # Elementwise, every output block written exactly once -> all parallel,
            # so v7x megacore can shard whichever axis has >= 2 blocks.
            dimension_semantics=("parallel", "parallel", "parallel"),
            vmem_limit_bytes=vmem_limit,
        ),
    )(x, pe)


if __name__ == "__main__":
    MAX_LEN = 64

    # Case 1: small shapes consistent with the module's forward: [batch, seq, d_model].
    B, S, D = 2, 8, 32
    x = jax.random.normal(jax.random.PRNGKey(0), (B, S, D), dtype=jnp.float32)
    pe = make_positional_encoding(d_model=D, max_len=MAX_LEN)
    out = jax.block_until_ready(positional_encoding_forward(x, pe))
    ref = x + pe[:S, :][None, :, :]
    assert out.shape == (B, S, D)
    assert jnp.allclose(out, ref, atol=1e-6, rtol=1e-6)

    # Case 2: lane-dense D with a sequence length that is NOT a multiple of the
    # row tile -> exercises the cdiv grid / masked ragged last block.
    B2, S2, D2 = 2, 20, 128
    x2 = jax.random.normal(jax.random.PRNGKey(1), (B2, S2, D2), dtype=jnp.float32)
    pe2 = make_positional_encoding(d_model=D2, max_len=MAX_LEN)
    out2 = jax.block_until_ready(positional_encoding_forward(x2, pe2))
    ref2 = x2 + pe2[:S2, :][None, :, :]
    assert jnp.allclose(out2, ref2, atol=1e-6, rtol=1e-6)

    # Case 3: bf16 activations + bf16 pe -> exercises the dtype-aware (16-row) sublane tile.
    B3, S3, D3 = 2, 32, 64
    x3 = jax.random.normal(jax.random.PRNGKey(2), (B3, S3, D3), dtype=jnp.float32).astype(jnp.bfloat16)
    pe3 = make_positional_encoding(d_model=D3, max_len=MAX_LEN, dtype=jnp.bfloat16)
    out3 = jax.block_until_ready(positional_encoding_forward(x3, pe3))
    ref3 = x3 + pe3[:S3, :][None, :, :]
    assert jnp.allclose(out3.astype(jnp.float32), ref3.astype(jnp.float32), atol=1e-2, rtol=1e-2)

    print("KERNEL_OK")
</pallas_src>

<mosaic_0001>
module attributes {stable_mosaic.version = 11 : i64} {
  func.func @_pe_add_kernel(%arg0: i32, %arg1: i32, %arg2: i32, %arg3: memref<1x8x32xf32, #tpu.memory_space<vmem>>, %arg4: memref<8x32xf32, #tpu.memory_space<vmem>>, %arg5: memref<1x8x32xf32, #tpu.memory_space<vmem>>) attributes {dimension_semantics = [#tpu.dimension_semantics<parallel>, #tpu.dimension_semantics<parallel>, #tpu.dimension_semantics<parallel>], iteration_bounds = array<i64: 1, 1, 2>, scalar_prefetch = 0 : i64, scratch_operands = 0 : i64, tpu.core_type = #tpu.core_type<tc>, window_params = [{transform_indices = @transform_0, window_bounds = array<i64: 1, 8, 32>}, {transform_indices = @transform_1, window_bounds = array<i64: 8, 32>}, {transform_indices = @transform_2, window_bounds = array<i64: 1, 8, 32>}]} {
    %c0 = arith.constant 0 : index
    %c0_0 = arith.constant 0 : index
    %c0_1 = arith.constant 0 : index
    %0 = vector.load %arg3[%c0, %c0_0, %c0_1] : memref<1x8x32xf32, #tpu.memory_space<vmem>>, vector<1x8x32xf32>
    %1 = vector.shape_cast %0 : vector<1x8x32xf32> to vector<8x32xf32>
    %c0_2 = arith.constant 0 : index
    %c0_3 = arith.constant 0 : index
    %2 = vector.load %arg4[%c0_2, %c0_3] : memref<8x32xf32, #tpu.memory_space<vmem>>, vector<8x32xf32>
    %3 = arith.addf %1, %2 : vector<8x32xf32>
    %c0_4 = arith.constant 0 : index
    %c0_5 = arith.constant 0 : index
    %c0_6 = arith.constant 0 : index
    %4 = vector.load %arg5[%c0_4, %c0_5, %c0_6] : memref<1x8x32xf32, #tpu.memory_space<vmem>>, vector<1x8x32xf32>
    %5 = vector.shape_cast %4 : vector<1x8x32xf32> to vector<8x32xf32>
    %6 = vector.shape_cast %3 : vector<8x32xf32> to vector<1x8x32xf32>
    tpu.vector_store %arg5[%c0_4, %c0_5, %c0_6], %6 {strides = array<i32>} : memref<1x8x32xf32, #tpu.memory_space<vmem>>, vector<1x8x32xf32>,
    return
  }
  func.func @transform_0(%arg0: i32, %arg1: i32, %arg2: i32) -> (i32, i32, i32) {
    %c0_i32 = arith.constant 0 : i32
    return %arg2, %arg0, %arg1 : i32, i32, i32
  }
  func.func @transform_1(%arg0: i32, %arg1: i32, %arg2: i32) -> (i32, i32) {
    %c0_i32 = arith.constant 0 : i32
    return %arg0, %arg1 : i32, i32
  }
  func.func @transform_2(%arg0: i32, %arg1: i32, %arg2: i32) -> (i32, i32, i32) {
    %c0_i32 = arith.constant 0 : i32
    return %arg2, %arg0, %arg1 : i32, i32, i32
  }
}

</mosaic_0001>

<bundles_post_ra>
// kernel: tpu_custom_call.1
= control target key start
LH: loop header
LB: loop body
LE: loop exit
PB: predicated region body
PF: predicated region fallthrough
CT: control target
= control target key end

     0   :  { %7 = vsyncpa [#allocation3], 0  ;;  %s607_s0 = inlined_call_operand.vmem [shape: f32[2,8,32], index: 0, kind: input, shape index: {}]   ;;  %s608_s1 = inlined_call_operand.vmem [shape: f32[64,32], index: 1, kind: input, shape index: {}]   ;;  %s609_s2 = inlined_call_operand.hbm [shape: f32[2,8,32], index: 2, kind: output, shape index: {}]  }
   0x1   :  { %9 = vsyncpa [#allocation3 + $0x1], 0  ;;  %s492_s9 = smov 0   ;;  %s494_s10 = smov 0  }
   0x2   :  { %s496_s11 = smov 0   ;;  %s498_s12 = smov 0  }
   0x3   :  { %s500_s13 = smov 0   ;;  %s502_s14 = smov 0  }
   0x4 LB: > { %s329_s15 = sadd.s32 4294967295, %s474_s14   ;;  %s330_s16 = sadd.s32 4294967294, %s474_s14   ;;  %s474_s14 = sphi %s502_s14, %s15_s14   ;;  %s470_s13 = sphi %s500_s13, %s616_s13   ;;  %s466_s12 = sphi %s498_s12, %s615_s12   ;;  %s462_s11 = sphi %s496_s11, %s614_s11   ;;  %s458_s10 = sphi %s494_s10, %s613_s10   ;;  %s454_s9 = sphi %s492_s9, %s612_s9  }
   0x5   : > { %s27_s17 = sadd.s32 1, %s470_s13  ;;  %s103_s18 = sadd.s32 1, %s462_s11 }
   0x6   : > { %p28_p0 = scmp.ge.s32.totalorder %s27_s17, 2  ;;  %p113_p1 = scmp.ne.s32.totalorder %s462_s11, %s458_s10 }
   0x7   : > { %p114_p2 = scmp.eq.s32.totalorder %s329_s15, 1  ;;  %p119_p3 = scmp.ne.s32.totalorder %s458_s10, %s454_s9 }
   0x8   : > { %s618_s17 = smov (%p28_p0, %s27_s17), 0  ;;  %p120_p5 = scmp.eq.s32.totalorder %s330_s16, 1 }
   0x9   : > { %p532_p4 = por %p114_p2, %p113_p1  ;;  %s96_s20 = ssub.s32 %s470_s13, %s618_s17 }
   0xa   : > { %p334_p6 = scmp.ge.s32.totalorder %s474_s14, 1  ;;  %p101_p7 = scmp.eq.s32.totalorder %s96_s20, 0 }
   0xb   : > { %p539_p8 = por %p120_p5, %p119_p3  ;;  %p161_p9 = scmp.lt.s32.totalorder %s474_s14, 3 }
   0xc   : > { %s545_s22 = scalar_select %p101_p7, %s462_s11, %s103_s18  }
   0xd   : > { %p162_p10 = pnand %p334_p6, %p161_p9 }
   0xe   : > { %s192_s23 = sand.u32 (!%p162_p10), 1, %s458_s10   ;;  %p195_p11 = scmp.lt.s32.totalorder (!%p162_p10), %s466_s12, 1  ;;  %v213_v0 = vld [vmem:[%s608_s1] sm:$0xff] (!%p162_p10)  ;;  %vm215_vm0 = vcmask (!%p162_p10), 261120  }
   0xf   : > { %165 = sbr.rel (%p162_p10) target bundleno = 43 (0x2b), region = 28  ;;  %s335_s24 = sshll.u32 (!%p162_p10), %s192_s23, 3 }
  0x10   : > { %s338_s26 = sshll.u32 (!%p162_p10), %s466_s12, 7  ;;  %s194_s30 = scalar_lea.vmem (!%p162_p10), [#allocation2], %s335_s24 }
  0x11   : > { %s233_s3 = sshll.u32 (!%p162_p10), %s194_s30, 4  ;;  %s218_s15 = scalar_lea.sflag (!%p162_p10), [#allocation3], %s192_s23  ;;  %s557_s3 = int_to_ptr.vmem [resolvable:$true] %s233_s3 }
  0x12   : > { %s396_s16 = scalar_lea.vmem (!%p162_p10), %s557_s3, 128  ;;  %s476_s18 = smov (!%p162_p10), [#allocation2]  }
  0x13   : > { %p397_p12 = scmp.ne.s32.totalorder (!%p162_p10), %s557_s3, %s396_s16  ;;  %s400_s20 = sshll.u32 (!%p162_p10), %s476_s18, 4  ;;  %s401_s20 = int_to_ptr.vmem [resolvable:$false] %s400_s20 }
  0x14   : > { %s402_s24 = scalar_lea.vmem (!%p162_p10), %s401_s20, 256  ;;  %p403_p1 = scmp.lt.s32.totalorder (!%p162_p10), %s557_s3, %s401_s20 }
  0x15   : > { %p398_p13 = pnand (!%p162_p10), %p397_p12, %p532_p4  ;;  %p404_p2 = scmp.lt.s32.totalorder (!%p162_p10), %s402_s24, %s396_s16 }
  0x16   : > { %s196_s25 = scalar_select %p195_p11, %s466_s12, 1 }
  0x17   : > { %s562_s12 = scalar_lea.hbm %s609_s2, %s338_s26  ;;  %p399_p0 = pneg %p398_p13 }
  0x18   : > { %s336_s27 = sshll.u32 %s196_s25, 3  ;;  %p405_p3 = por %p404_p2, %p403_p1 }
  0x19   : > { %s204_s6 = scalar_lea.vmem %s607_s0, %s336_s27 }
  0x1a   : > { %v212_v1 = vld [vmem:[%s204_s6] sm:$0xff]  ;;  %p406_p5 = pnand %p405_p3, %p399_p0 }
  0x1b   : > { %v214_v2 = vadd.f32 %v213_v0, %v212_v1 }
  0x1d   : > { %216 = vst.msk [vmem:[%s194_s30] sm:$0xff] %vm215_vm0, %v214_v2 }
  0x1e   : > { %409 = shalt.err (!%p406_p5)
}
  0x1f   : > { %s410_s23 = scalar_lea.hbm %s562_s12, 128  ;;  %s414_s27 = scalar_lea.hbm %s609_s2, 256 }
  0x20   : > { %p411_p6 = scmp.ne.s32.totalorder %s562_s12, %s410_s23  ;;  %p415_p10 = scmp.lt.u32.totalorder %s562_s12, %s609_s2 }
  0x21   : > { %p416_p11 = scmp.lt.u32.totalorder %s414_s27, %s410_s23  ;;  %p418_p13 = scmp.lt.u32.totalorder %s410_s23, %s562_s12 }
  0x22   : > { %p412_p7 = pnand %p411_p6, %p532_p4 }
  0x23   : > { %p417_p12 = por %p416_p11, %p415_p10 }
  0x24   : > { %p413_p9 = pneg %p412_p7 }
  0x25   : > { %p419_p0 = por %p418_p13, %p417_p12 }
  0x27   : > { %p420_p1 = pnand %p419_p0, %p413_p9 }
  0x29   : > { %423 = shalt.err (!%p420_p1)
}
  0x2a   : > { %341 = dma.vmem_to_hbm [thread:$0]  (%p532_p4), %s557_s3, 128, %s562_s12, %s218_s15  }
  0x2b PF: > { %p347_p2 = scmp.ge.s32.totalorder %s474_s14, 2  ;;  %s245_s30 = sand.u32 1, %s454_s9  }
  0x2c   : > { %s246_s4 = scalar_lea.sflag [#allocation3], %s245_s30 }
  0x2d   : > { %p344_p3 = pnand %p347_p2, %p539_p8 }
  0x2f   : > { %449 = dma.done.wait (!%p344_p3), %s246_s4, 128  }
  0x30   : > { %451 = vsyncadd (!%p344_p3), %s246_s4, 4294967168  ;;  %s15_s14 = sadd.s32 1, %s474_s14   ;;  %s612_s9 = smov %s458_s10 }
  0x31   : > { %p12_p5 = scmp.ge.s32.totalorder %s15_s14, 4   ;;  %s613_s10 = smov %s462_s11 }
  0x32   : > { %s614_s11 = smov %s545_s22  ;;  %s615_s12 = smov %s470_s13 }
  0x33   : > { %s616_s13 = smov %s618_s17  ;;  %14 = sbr.rel (!%p12_p5) target bundleno = 4 (0x4), region = 66 }
  0x3a   :  { %251 = vsyncpa [#allocation3], 1 }
  0x3b   :  { %253 = vsyncpa [#allocation3 + $0x1], 1 }

</bundles_post_ra>
